<compile_context>
chip_gen: v7x
topology: tpu7x:2x2x1
jax: 0.10.0
libtpu: 0.0.40
codegen_flags: <defaults>
</compile_context>

<pallas_src>
import math

import jax
import jax.numpy as jnp
from jax.experimental import pallas as pl
from jax.experimental.pallas import tpu as pltpu

_SIGMA = 1.0
# NOTE: eps is added inside the sqrt to 2*pi (not to sigma/denominator) to
# faithfully match the PyTorch reference.  Intentional, do not "fix".
_INV_DENOM = 1.0 / (_SIGMA * math.sqrt(2.0 * math.pi + 1e-8))


def _gaussian_loss_kernel(mu_ref, y_ref, o_ref):
    mu = mu_ref[0]                                # SMEM scalar
    y = y_ref[...].astype(jnp.float32)            # keep exp in f32 even for bf16 inputs
    z = y - mu                                    # sigma == 1.0 -> no divide
    pdf = jnp.exp(-0.5 * (z * z)) * _INV_DENOM    # constant folded in wrapper
    o_ref[...] = (1.0 - pdf).astype(o_ref.dtype)


def _gaussian_loss_jnp(y, mu):
    """Tiny fallback path (used only for a <128-element ragged tail)."""
    z = y.astype(jnp.float32) - jnp.float32(mu)
    return (1.0 - jnp.exp(-0.5 * z * z) * _INV_DENOM).astype(y.dtype)


def gaussian_loss(y_pred, threshold, *, block_rows=4096):
    """Elementwise 1 - N(y; mu=threshold, sigma=1) pdf.  Any shape; same shape/dtype out.

    block_rows is measured in 128-lane rows: 4096 -> 2 MiB f32 blocks (good default
    for v5e/v6e; on v7x larger values, e.g. 8192-16384, keep it at the HBM roofline).
    """
    orig_shape = y_pred.shape
    dtype = y_pred.dtype
    itemsize = jnp.dtype(dtype).itemsize
    n = y_pred.size

    flat = jnp.ravel(y_pred)
    mu = jnp.asarray(threshold, jnp.float32).reshape((1,))   # SMEM scalar, no retrace per value

    # Widest lane-dense last dim that divides n -> fewer, larger vld/vst + DMA descriptors.
    lanes = None
    for w in (2048, 1024, 512, 256, 128):
        if n % w == 0:
            lanes = w
            break

    if lanes is None:
        # Ragged tail (< 128 elements): main slab through the kernel, tail in plain jnp.
        lanes = 128
        n_main = (n // lanes) * lanes
        if n_main == 0:                       # tiny tensor: no kernel needed
            return _gaussian_loss_jnp(flat, threshold).reshape(orig_shape)
        main, tail = flat[:n_main], flat[n_main:]
    else:
        n_main, main, tail = n, flat, None

    rows = n_main // lanes
    x2d = main.reshape(rows, lanes)

    # ~2 MiB (f32-equivalent) blocks regardless of lane width.
    tile_rows = max(1, (block_rows * 128) // lanes)
    if tile_rows >= rows:
        tile_rows = rows                      # full extent: no divisibility requirement
    else:
        # keep sublane dim friendly for packed dtypes (f32:8, bf16:16, int8/fp8:32)
        sub = {4: 8, 2: 16, 1: 32}.get(itemsize, 8)
        tile_rows = max(sub, (tile_rows // sub) * sub)
    grid = (pl.cdiv(rows, tile_rows),)        # ragged last block is masked by Pallas

    out2d = pl.pallas_call(
        _gaussian_loss_kernel,
        out_shape=jax.ShapeDtypeStruct((rows, lanes), dtype),
        grid=grid,
        in_specs=[
            pl.BlockSpec(memory_space=pltpu.MemorySpace.SMEM),         # mu scalar
            pl.BlockSpec((tile_rows, lanes), lambda i: (i, 0)),
        ],
        out_specs=pl.BlockSpec((tile_rows, lanes), lambda i: (i, 0)),
        compiler_params=pltpu.CompilerParams(
            dimension_semantics=("parallel",),       # shards the row grid across TCs on v7x
        ),
        cost_estimate=pl.CostEstimate(
            flops=4 * n_main,
            transcendentals=n_main,
            bytes_accessed=2 * n_main * itemsize,
        ),
    )(mu, x2d)

    out = out2d.reshape(-1)
    if tail is not None:
        out = jnp.concatenate([out, _gaussian_loss_jnp(tail, threshold)])
    return out.reshape(orig_shape)


def gaussian_loss_ref(y_pred, threshold):
    mu = jnp.float32(threshold)
    sigma = 1.0
    pdf = jnp.exp(-0.5 * ((y_pred - mu) / sigma) ** 2) / (
        sigma * jnp.sqrt(2.0 * jnp.pi + 1e-8)
    )
    return (1.0 - pdf).astype(y_pred.dtype)


if __name__ == "__main__":
    key = jax.random.PRNGKey(0)
    threshold = 0.5

    # NCHW input, as the PyTorch module would receive from a conv stack.
    y_pred = jax.random.normal(key, (2, 4, 16, 16), dtype=jnp.float32)
    out = jax.block_until_ready(gaussian_loss(y_pred, threshold))
    ref = gaussian_loss_ref(y_pred, threshold)
    assert out.shape == y_pred.shape and out.dtype == y_pred.dtype
    assert jnp.allclose(out, ref, atol=1e-6, rtol=1e-6), "mismatch vs reference (main path)"

    # Ragged shape (n not divisible by 128) exercises the kernel + jnp tail path.
    y_odd = jax.random.normal(jax.random.PRNGKey(1), (3, 5, 7, 11), dtype=jnp.float32)
    out_odd = jax.block_until_ready(gaussian_loss(y_odd, threshold))
    ref_odd = gaussian_loss_ref(y_odd, threshold)
    assert out_odd.shape == y_odd.shape and out_odd.dtype == y_odd.dtype
    assert jnp.allclose(out_odd, ref_odd, atol=1e-6, rtol=1e-6), "mismatch vs reference (tail path)"

    print("KERNEL_OK")
</pallas_src>

<mosaic_0001>
module attributes {stable_mosaic.version = 11 : i64} {
  func.func @_gaussian_loss_kernel(%arg0: i32, %arg1: memref<1xf32, #tpu.memory_space<smem>>, %arg2: memref<1x2048xf32, #tpu.memory_space<vmem>>, %arg3: memref<1x2048xf32, #tpu.memory_space<vmem>>) attributes {dimension_semantics = [#tpu.dimension_semantics<parallel>], iteration_bounds = array<i64: 1>, scalar_prefetch = 0 : i64, scratch_operands = 0 : i64, tpu.core_type = #tpu.core_type<tc>, window_params = [{transform_indices = @transform_0, window_bounds = array<i64: 1>}, {transform_indices = @transform_1, window_bounds = array<i64: 1, 2048>}, {transform_indices = @transform_2, window_bounds = array<i64: 1, 2048>}]} {
    %c0 = arith.constant 0 : index
    %0 = memref.load %arg1[%c0] : memref<1xf32, #tpu.memory_space<smem>>
    %c0_0 = arith.constant 0 : index
    %c0_1 = arith.constant 0 : index
    %1 = vector.load %arg2[%c0_0, %c0_1] : memref<1x2048xf32, #tpu.memory_space<vmem>>, vector<1x2048xf32>
    %2 = vector.broadcast %0 : f32 to vector<1x2048xf32>
    %3 = arith.subf %1, %2 : vector<1x2048xf32>
    %4 = arith.mulf %3, %3 : vector<1x2048xf32>
    %cst = arith.constant -5.000000e-01 : f32
    %5 = vector.broadcast %cst : f32 to vector<1x2048xf32>
    %6 = arith.mulf %5, %4 : vector<1x2048xf32>
    %7 = math.exp %6 : vector<1x2048xf32>
    %cst_2 = arith.constant 0.398942292 : f32
    %8 = vector.broadcast %cst_2 : f32 to vector<1x2048xf32>
    %9 = arith.mulf %7, %8 : vector<1x2048xf32>
    %cst_3 = arith.constant 1.000000e+00 : f32
    %10 = vector.broadcast %cst_3 : f32 to vector<1x2048xf32>
    %11 = arith.subf %10, %9 : vector<1x2048xf32>
    %c0_4 = arith.constant 0 : index
    %c0_5 = arith.constant 0 : index
    %12 = vector.load %arg3[%c0_4, %c0_5] : memref<1x2048xf32, #tpu.memory_space<vmem>>, vector<1x2048xf32>
    tpu.vector_store %arg3[%c0_4, %c0_5], %11 {strides = array<i32>} : memref<1x2048xf32, #tpu.memory_space<vmem>>, vector<1x2048xf32>,
    return
  }
  func.func @transform_0(%arg0: i32) -> i32 {
    %c0_i32 = arith.constant 0 : i32
    %c0_i32_0 = arith.constant 0 : i32
    return %c0_i32 : i32
  }
  func.func @transform_1(%arg0: i32) -> (i32, i32) {
    %c0_i32 = arith.constant 0 : i32
    %c0_i32_0 = arith.constant 0 : i32
    return %arg0, %c0_i32 : i32, i32
  }
  func.func @transform_2(%arg0: i32) -> (i32, i32) {
    %c0_i32 = arith.constant 0 : i32
    %c0_i32_0 = arith.constant 0 : i32
    return %arg0, %c0_i32 : i32, i32
  }
}

</mosaic_0001>

<bundles_post_ra>
// kernel: tpu_custom_call.1
= control target key start
LH: loop header
LB: loop body
LE: loop exit
PB: predicated region body
PF: predicated region fallthrough
CT: control target
= control target key end

     0   :  { %8 = vsyncpa [#allocation4], 0  ;;  %s158_s0 = inlined_call_operand.<no memory space> [shape: f32[1], index: 0, kind: input, shape index: {}]   ;;  %s159_s1 = inlined_call_operand.hbm [shape: f32[1,2048], index: 1, kind: input, shape index: {}]   ;;  %s160_s2 = inlined_call_operand.hbm [shape: f32[1,2048], index: 2, kind: output, shape index: {}]  }
   0x1   :  { %9 = vsyncpa [#allocation5], 0  ;;  %s114_s9 = smov [#allocation3]   ;;  %s66_s13 = scalar_lea.hbm %s159_s1, 256 }
   0x2   :  { %s18_s10 = sshll.u32 %s114_s9, 4  ;;  %p67_p0 = scmp.ne.s32.totalorder %s159_s1, %s66_s13  ;;  %s19_s10 = int_to_ptr.vmem [resolvable:$true] %s18_s10 }
   0x3   :  { %p70_p1 = scmp.lt.u32.totalorder %s66_s13, %s159_s1 }
   0x5   :  { %p72_p2 = pnand %p70_p1, %p67_p0 }
   0x7   :  { %75 = shalt.err (!%p72_p2)
}
   0x8   :  { %s76_s18 = scalar_lea.vmem %s19_s10, 256  ;;  %p81_p4 = scmp.lt.s32.totalorder %s19_s10, %s19_s10 }
   0x9   :  { %p77_p3 = scmp.ne.s32.totalorder %s19_s10, %s76_s18  ;;  %p82_p5 = scmp.lt.s32.totalorder %s76_s18, %s76_s18 }
   0xb   :  { %p83_p6 = por %p82_p5, %p81_p4 }
   0xd   :  { %p84_p7 = pnand %p83_p6, %p77_p3 }
   0xf   :  { %87 = shalt.err (!%p84_p7)
}
  0x10   :  { %21 = dma.hbm_to_vmem [thread:$0]  %s159_s1, 256, %s19_s10, [#allocation4]  }
  0x11   :  { %110 = dma.done.wait [#allocation4], 256  }
  0x12   :  { %111 = vsyncadd [#allocation4], 4294967040  ;;  %v28_v0 = vstv %s158_s0  ;;  %v26_v1 = vld [vmem:[#allocation3] sm:$0xff]  ;;  %v27_v2 = vld [vmem:[#allocation3 + $0x8] sm:$0xff]  ;;  %s115_s1 = smov [#allocation6]  }
  0x13   :  { %v29_v3 = vsub.f32 %v26_v1, %v28_v0  ;;  %v30_v4 = vsub.f32 %v27_v2, %v28_v0  ;;  %s51_s23 = sshll.u32 %s115_s1, 4  ;;  %s52_s23 = int_to_ptr.vmem [resolvable:$true] %s51_s23 }
  0x14   :  { %s88_s0 = scalar_lea.vmem %s52_s23, 256  ;;  %p93_p9 = scmp.lt.s32.totalorder %s52_s23, %s52_s23 }
  0x15   :  { %v31_v5 = vmul.f32 %v29_v3, %v29_v3  ;;  %v32_v6 = vmul.f32 %v30_v4, %v30_v4  ;;  %p89_p8 = scmp.ne.s32.totalorder %s52_s23, %s88_s0  ;;  %p94_p10 = scmp.lt.s32.totalorder %s88_s0, %s88_s0 }
  0x17   :  { %v33_v7 = vmul.f32 -0.5, %v31_v5  ;;  %v34_v8 = vmul.f32 -0.5, %v32_v6  ;;  %p95_p11 = por %p94_p10, %p93_p9 }
  0x19   :  { %v35_v9 = vmul.f32 1.442695, %v33_v7  ;;  %v37_v10 = vmul.f32 1.442695, %v34_v8  ;;  %p96_p12 = pnand %p95_p11, %p89_p8 }
  0x1b   :  { %62 = vpow2.f32 %v35_v9 }
  0x1c   :  { %64 = vpow2.f32 %v37_v10 }
  0x25   :  { %v63_v11 = vpop.eup %62 }
  0x26   :  { %v65_v12 = vpop.eup %64  ;;  %v39_v13 = vmul.f32 0.3989423, %v63_v11 }
  0x27   :  { %v40_v14 = vmul.f32 0.3989423, %v65_v12 }
  0x28   :  { %v41_v15 = vsub.f32 1.0, %v39_v13 }
  0x29   :  { %v42_v16 = vsub.f32 1.0, %v40_v14 }
  0x2a   :  { %43 = vst [vmem:[#allocation6] sm:$0xff] %v41_v15 }
  0x2b   :  { %44 = vst [vmem:[#allocation6 + $0x8] sm:$0xff] %v42_v16 }
  0x2c   :  { %99 = shalt.err (!%p96_p12)
}
  0x2d   :  { %s100_s26 = scalar_lea.hbm %s160_s2, 256 }
  0x2e   :  { %p101_p13 = scmp.ne.s32.totalorder %s160_s2, %s100_s26  ;;  %p104_p0 = scmp.lt.u32.totalorder %s100_s26, %s160_s2 }
  0x30   :  { %p106_p1 = pnand %p104_p0, %p101_p13 }
  0x32   :  { %109 = shalt.err (!%p106_p1)
}
  0x33   :  { %54 = dma.vmem_to_hbm [thread:$0]  %s52_s23, 256, %s160_s2, [#allocation5]  }
  0x34   :  { %112 = dma.done.wait [#allocation5], 256  }
  0x35   :  { %113 = vsyncadd [#allocation5], 4294967040 }
  0x36   :  { %58 = vsyncpa [#allocation4], 1 }
  0x37   :  { %59 = vsyncpa [#allocation5], 1 }

</bundles_post_ra>
